<compile_context>
chip_gen: v5e
topology: v5e:2x2
jax: 0.10.0
libtpu: 0.0.40
codegen_flags: <defaults>
</compile_context>

<pallas_src>
import jax
import jax.numpy as jnp
from jax import lax
from jax.experimental import pallas as pl
from jax.experimental.pallas import tpu as pltpu


def _round_up(n, m):
    return ((n + m - 1) // m) * m


def dnn2_kernel(x_ref, w1_ref, b1_ref, w2_ref, b2_ref, out_ref, y_ref):
    # x_ref : [TB, Gp]  bf16
    # w1_ref: [Hp, Gp]  bf16   (PyTorch [out, in] layout)
    # b1_ref: [1,  Hp]  f32
    # w2_ref: [Gp, Hp]  bf16   (PyTorch [out, in] layout)
    # b2_ref: [1,  Gp]  f32
    x = x_ref[...]

    # y = relu(x @ W1^T + b1): contract x's feature axis with W1's 'in' axis.
    y_f32 = lax.dot_general(
        x, w1_ref[...],
        dimension_numbers=(((1,), (1,)), ((), ())),
        preferred_element_type=jnp.float32)
    y_f32 = jnp.maximum(y_f32 + b1_ref[...], 0.0)
    y_ref[...] = y_f32.astype(y_ref.dtype)

    # out = relu(y @ W2^T + b2): feed y back to the MXU in bf16, accumulate f32.
    o_f32 = lax.dot_general(
        y_f32.astype(jnp.bfloat16), w2_ref[...],
        dimension_numbers=(((1,), (1,)), ((), ())),
        preferred_element_type=jnp.float32)
    o_f32 = jnp.maximum(o_f32 + b2_ref[...], 0.0)
    out_ref[...] = o_f32.astype(out_ref.dtype)


def dnn2_forward(x, W1, b1, W2, b2, *, block_b=128):
    """Pallas forward of dnn2.

    x:  [B, G_in]
    W1: [hidden, G_in]  (PyTorch nn.Linear weight layout [out, in])
    b1: [hidden]
    W2: [G_in, hidden]
    b2: [G_in]
    Returns (out_x, y, W1, W2, b1, b2) like the PyTorch module.
    """
    B, G_in = x.shape
    hidden = W1.shape[0]
    out_dtype = x.dtype

    # Lane-dense padding (multiples of 128 on the last dim of every operand).
    Gp = _round_up(G_in, 128)
    Hp = _round_up(hidden, 128)
    TB = min(block_b, _round_up(B, 8))
    Bp = _round_up(B, TB)

    # Glue: zero-pad + cast matmul operands to bf16 (exact under linear+ReLU;
    # padded rows/cols are discarded below).  Biases stay f32 for the VPU.
    x_p = jnp.pad(x, ((0, Bp - B), (0, Gp - G_in))).astype(jnp.bfloat16)
    W1_p = jnp.pad(W1, ((0, Hp - hidden), (0, Gp - G_in))).astype(jnp.bfloat16)
    W2_p = jnp.pad(W2, ((0, Gp - G_in), (0, Hp - hidden))).astype(jnp.bfloat16)
    b1_p = jnp.pad(b1, (0, Hp - hidden)).reshape(1, Hp).astype(jnp.float32)
    b2_p = jnp.pad(b2, (0, Gp - G_in)).reshape(1, Gp).astype(jnp.float32)

    n_b = Bp // TB

    out_p, y_p = pl.pallas_call(
        dnn2_kernel,
        out_shape=(
            jax.ShapeDtypeStruct((Bp, Gp), out_dtype),  # out_x (final activation)
            jax.ShapeDtypeStruct((Bp, Hp), out_dtype),  # y     (hidden activation)
        ),
        grid=(n_b,),
        in_specs=[
            pl.BlockSpec((TB, Gp), lambda i: (i, 0)),   # x tile, marches over batch
            pl.BlockSpec((Hp, Gp), lambda i: (0, 0)),   # W1 resident in VMEM
            pl.BlockSpec((1, Hp), lambda i: (0, 0)),    # b1 resident
            pl.BlockSpec((Gp, Hp), lambda i: (0, 0)),   # W2 resident
            pl.BlockSpec((1, Gp), lambda i: (0, 0)),    # b2 resident
        ],
        out_specs=(
            pl.BlockSpec((TB, Gp), lambda i: (i, 0)),
            pl.BlockSpec((TB, Hp), lambda i: (i, 0)),
        ),
        compiler_params=pltpu.CompilerParams(
            dimension_semantics=("parallel",),
            vmem_limit_bytes=64 * 1024 * 1024,
        ),
    )(x_p, W1_p, b1_p, W2_p, b2_p)

    out_x = out_p[:B, :G_in]
    y = y_p[:B, :hidden]
    return out_x, y, W1, W2, b1, b2


def xavier_uniform(key, out_dim, in_dim, dtype=jnp.float32):
    limit = jnp.sqrt(6.0 / (in_dim + out_dim)).astype(dtype)
    return jax.random.uniform(key, (out_dim, in_dim), dtype, -limit, limit)


if __name__ == "__main__":
    # Small shapes consistent with the module: G_in features, hidden width w1.
    B, G_in, hidden = 8, 32, 64

    key = jax.random.PRNGKey(0)
    kx, kw1, kb1, kw2, kb2 = jax.random.split(key, 5)

    x = jax.random.normal(kx, (B, G_in), jnp.float32)

    # Deterministic parameter init (xavier-uniform weights; small uniform biases
    # since xavier_uniform_ on a 1-D bias is ill-defined in PyTorch anyway).
    W1 = xavier_uniform(kw1, hidden, G_in)            # fc1.weight [w1, G_in]
    b1 = jax.random.uniform(kb1, (hidden,), jnp.float32, -0.1, 0.1)
    W2 = xavier_uniform(kw2, G_in, hidden)            # fc2.weight [G_in, w1]
    b2 = jax.random.uniform(kb2, (G_in,), jnp.float32, -0.1, 0.1)

    out_x, y, ww1, ww2, bb1, bb2 = dnn2_forward(x, W1, b1, W2, b2)
    jax.block_until_ready((out_x, y, ww1, ww2, bb1, bb2))

    # Reference in plain f32 JAX (same math as the PyTorch forward).
    # Tolerance is loosened because the kernel runs bf16 MXU inputs with f32
    # accumulation (expected, not a bug).
    y_ref = jnp.maximum(x @ W1.T + b1, 0.0)
    x_ref = jnp.maximum(y_ref @ W2.T + b2, 0.0)
    assert out_x.shape == (B, G_in) and y.shape == (B, hidden)
    assert ww1.shape == (hidden, G_in) and ww2.shape == (G_in, hidden)
    assert bb1.shape == (hidden,) and bb2.shape == (G_in,)
    assert jnp.allclose(y, y_ref, atol=2e-2, rtol=2e-2), "y mismatch"
    assert jnp.allclose(out_x, x_ref, atol=2e-2, rtol=2e-2), "x mismatch"

    print("KERNEL_OK")
</pallas_src>

<mosaic_0001>
module attributes {stable_mosaic.version = 11 : i64} {
  func.func @dnn2_kernel(%arg0: i32, %arg1: memref<8x128xbf16, #tpu.memory_space<vmem>>, %arg2: memref<128x128xbf16, #tpu.memory_space<vmem>>, %arg3: memref<1x128xf32, #tpu.memory_space<vmem>>, %arg4: memref<128x128xbf16, #tpu.memory_space<vmem>>, %arg5: memref<1x128xf32, #tpu.memory_space<vmem>>, %arg6: memref<8x128xf32, #tpu.memory_space<vmem>>, %arg7: memref<8x128xf32, #tpu.memory_space<vmem>>) attributes {dimension_semantics = [#tpu.dimension_semantics<parallel>], iteration_bounds = array<i64: 1>, scalar_prefetch = 0 : i64, scratch_operands = 0 : i64, tpu.core_type = #tpu.core_type<tc>, window_params = [{transform_indices = @transform_0, window_bounds = array<i64: 8, 128>}, {pipeline_mode = #tpu.pipeline_mode<synchronous>, transform_indices = @transform_1, window_bounds = array<i64: 128, 128>}, {pipeline_mode = #tpu.pipeline_mode<synchronous>, transform_indices = @transform_2, window_bounds = array<i64: 1, 128>}, {pipeline_mode = #tpu.pipeline_mode<synchronous>, transform_indices = @transform_3, window_bounds = array<i64: 128, 128>}, {pipeline_mode = #tpu.pipeline_mode<synchronous>, transform_indices = @transform_4, window_bounds = array<i64: 1, 128>}, {transform_indices = @transform_5, window_bounds = array<i64: 8, 128>}, {transform_indices = @transform_6, window_bounds = array<i64: 8, 128>}]} {
    %c0 = arith.constant 0 : index
    %c0_0 = arith.constant 0 : index
    %0 = vector.load %arg1[%c0, %c0_0] : memref<8x128xbf16, #tpu.memory_space<vmem>>, vector<8x128xbf16>
    %c0_1 = arith.constant 0 : index
    %c0_2 = arith.constant 0 : index
    %1 = vector.load %arg2[%c0_1, %c0_2] : memref<128x128xbf16, #tpu.memory_space<vmem>>, vector<128x128xbf16>
    %cst = arith.constant dense<0.000000e+00> : vector<8x128xf32>
    %2 = tpu.matmul %0, %1, %cst {dimension_numbers = #tpu.dot_dimension_numbers<[1], [1], [0], [0], [0, 0, 1, 0], [], []>} : vector<8x128xbf16>, vector<128x128xbf16>, vector<8x128xf32> -> vector<8x128xf32>
    %c0_3 = arith.constant 0 : index
    %c0_4 = arith.constant 0 : index
    %3 = vector.load %arg3[%c0_3, %c0_4] : memref<1x128xf32, #tpu.memory_space<vmem>>, vector<1x128xf32>
    %4 = vector.broadcast %3 : vector<1x128xf32> to vector<8x128xf32>
    %5 = arith.addf %2, %4 : vector<8x128xf32>
    %cst_5 = arith.constant 0.000000e+00 : f32
    %6 = vector.broadcast %cst_5 : f32 to vector<8x128xf32>
    %7 = arith.maximumf %5, %6 : vector<8x128xf32>
    %c0_6 = arith.constant 0 : index
    %c0_7 = arith.constant 0 : index
    %8 = vector.load %arg7[%c0_6, %c0_7] : memref<8x128xf32, #tpu.memory_space<vmem>>, vector<8x128xf32>
    tpu.vector_store %arg7[%c0_6, %c0_7], %7 {strides = array<i32>} : memref<8x128xf32, #tpu.memory_space<vmem>>, vector<8x128xf32>,
    %9 = arith.truncf %7 : vector<8x128xf32> to vector<8x128xbf16>
    %c0_8 = arith.constant 0 : index
    %c0_9 = arith.constant 0 : index
    %10 = vector.load %arg4[%c0_8, %c0_9] : memref<128x128xbf16, #tpu.memory_space<vmem>>, vector<128x128xbf16>
    %cst_10 = arith.constant dense<0.000000e+00> : vector<8x128xf32>
    %11 = tpu.matmul %9, %10, %cst_10 {dimension_numbers = #tpu.dot_dimension_numbers<[1], [1], [0], [0], [0, 0, 1, 0], [], []>} : vector<8x128xbf16>, vector<128x128xbf16>, vector<8x128xf32> -> vector<8x128xf32>
    %c0_11 = arith.constant 0 : index
    %c0_12 = arith.constant 0 : index
    %12 = vector.load %arg5[%c0_11, %c0_12] : memref<1x128xf32, #tpu.memory_space<vmem>>, vector<1x128xf32>
    %13 = vector.broadcast %12 : vector<1x128xf32> to vector<8x128xf32>
    %14 = arith.addf %11, %13 : vector<8x128xf32>
    %cst_13 = arith.constant 0.000000e+00 : f32
    %15 = vector.broadcast %cst_13 : f32 to vector<8x128xf32>
    %16 = arith.maximumf %14, %15 : vector<8x128xf32>
    %c0_14 = arith.constant 0 : index
    %c0_15 = arith.constant 0 : index
    %17 = vector.load %arg6[%c0_14, %c0_15] : memref<8x128xf32, #tpu.memory_space<vmem>>, vector<8x128xf32>
    tpu.vector_store %arg6[%c0_14, %c0_15], %16 {strides = array<i32>} : memref<8x128xf32, #tpu.memory_space<vmem>>, vector<8x128xf32>,
    return
  }
  func.func @transform_0(%arg0: i32) -> (i32, i32) {
    %c0_i32 = arith.constant 0 : i32
    %c0_i32_0 = arith.constant 0 : i32
    return %arg0, %c0_i32 : i32, i32
  }
  func.func @transform_1(%arg0: i32) -> (i32, i32) {
    %c0_i32 = arith.constant 0 : i32
    %c0_i32_0 = arith.constant 0 : i32
    %c0_i32_1 = arith.constant 0 : i32
    return %c0_i32, %c0_i32_0 : i32, i32
  }
  func.func @transform_2(%arg0: i32) -> (i32, i32) {
    %c0_i32 = arith.constant 0 : i32
    %c0_i32_0 = arith.constant 0 : i32
    %c0_i32_1 = arith.constant 0 : i32
    return %c0_i32, %c0_i32_0 : i32, i32
  }
  func.func @transform_3(%arg0: i32) -> (i32, i32) {
    %c0_i32 = arith.constant 0 : i32
    %c0_i32_0 = arith.constant 0 : i32
    %c0_i32_1 = arith.constant 0 : i32
    return %c0_i32, %c0_i32_0 : i32, i32
  }
  func.func @transform_4(%arg0: i32) -> (i32, i32) {
    %c0_i32 = arith.constant 0 : i32
    %c0_i32_0 = arith.constant 0 : i32
    %c0_i32_1 = arith.constant 0 : i32
    return %c0_i32, %c0_i32_0 : i32, i32
  }
  func.func @transform_5(%arg0: i32) -> (i32, i32) {
    %c0_i32 = arith.constant 0 : i32
    %c0_i32_0 = arith.constant 0 : i32
    return %arg0, %c0_i32 : i32, i32
  }
  func.func @transform_6(%arg0: i32) -> (i32, i32) {
    %c0_i32 = arith.constant 0 : i32
    %c0_i32_0 = arith.constant 0 : i32
    return %arg0, %c0_i32 : i32, i32
  }
}

</mosaic_0001>

<bundles_post_ra>
// kernel: tpu_custom_call.1
= control target key start
LH: loop header
LB: loop body
LE: loop exit
PB: predicated region body
PF: predicated region fallthrough
CT: control target
= control target key end

     0   :  { %12 = vsyncpa [#allocation3], 0  ;;  %s551_s0 = inlined_call_operand.hbm [shape: bf16[8,128], index: 0, kind: input, shape index: {}]   ;;  %s552_s1 = inlined_call_operand.hbm [shape: bf16[128,128], index: 1, kind: input, shape index: {}]   ;;  %s553_s2 = inlined_call_operand.vmem [shape: f32[1,128], index: 2, kind: input, shape index: {}]   ;;  %s554_s3 = inlined_call_operand.hbm [shape: bf16[128,128], index: 3, kind: input, shape index: {}]   ;;  %s555_s4 = inlined_call_operand.vmem [shape: f32[1,128], index: 4, kind: input, shape index: {}]   ;;  %s556_s5 = inlined_call_operand.hbm [shape: f32[8,128], index: 5, kind: output, shape index: {0}]   ;;  %s557_s6 = inlined_call_operand.hbm [shape: f32[8,128], index: 6, kind: output, shape index: {1}]  }
   0x1   :  { %13 = vsyncpa [#allocation6], 0 }
   0x2   :  { %14 = vsyncpa [#allocation4], 0  ;;  %s31_s23 = sshll.u32 %s552_s1, 4  ;;  %s32_s23 = int_to_ptr.hbm [resolvable:$true] %s31_s23 }
   0x3   :  { %15 = vsyncpa [#allocation10], 0  ;;  %s488_s24 = smov [#allocation5]   ;;  %s21_s28 = sshll.u32 %s551_s0, 4  ;;  %s22_s28 = int_to_ptr.hbm [resolvable:$true] %s21_s28 }
   0x4   :  { %s33_s25 = sshll.u32 %s488_s24, 4  ;;  %s489_s29 = smov 64   ;;  %s34_s25 = int_to_ptr.vmem [resolvable:$true] %s33_s25 }
   0x5   :  { %s490_s30 = smov 4   ;;  %s491_s7 = smov [#allocation2]  }
   0x6   :  { %39 = dma.hbm_to_vmem [thread:$0]  %s32_s23, 1024, %s34_s25, [#allocation6], %s489_s29, %s489_s29, %s490_s30  }
   0x7   :  { %s23_s8 = sshll.u32 %s491_s7, 4  ;;  %s46_s11 = sshll.u32 %s554_s3, 4  ;;  %s24_s8 = int_to_ptr.vmem [resolvable:$true] %s23_s8  ;;  %s47_s11 = int_to_ptr.hbm [resolvable:$true] %s46_s11 }
   0x8   :  { %26 = dma.hbm_to_vmem [thread:$0]  %s22_s28, 64, %s24_s8, [#allocation3]  }
   0x9   :  { %s492_s1 = smov [#allocation7]  }
   0xa   :  { %s48_s12 = sshll.u32 %s492_s1, 4  ;;  %s49_s12 = int_to_ptr.vmem [resolvable:$true] %s48_s12 }
   0xb   :  { %54 = dma.hbm_to_vmem [thread:$0]  %s47_s11, 1024, %s49_s12, [#allocation6], %s489_s29, %s489_s29, %s490_s30  }
   0xc   :  { %480 = dma.done.wait [#allocation3], 64  }
   0xd   :  { %481 = vsyncadd [#allocation3], 4294967232 }
   0xe   :  { %482 = dma.done.wait [#allocation6], 2048  }
   0xf   :  { %483 = vsyncadd [#allocation6], 4294965248  ;;  %v342_v0 = vld [vmem:[#allocation5 + $0x38] sm:$0xff]  ;;  %v341_v1 = vld [vmem:[#allocation5 + $0x30] sm:$0xff]  ;;  %s493_s13 = smov [#allocation9]   ;;  %s255_s17 = sshll.u32 %s557_s6, 4  ;;  %s256_s17 = int_to_ptr.hbm [resolvable:$true] %s255_s17 }
  0x10   :  { %138 = vmatpush.bf16.xpose.msra.mxu0 %v342_v0  ;;  %v340_v2 = vld [vmem:[#allocation5 + $0x28] sm:$0xff]  ;;  %v339_v3 = vld [vmem:[#allocation5 + $0x20] sm:$0xff]  ;;  %v338_v4 = vld [vmem:[#allocation5 + $0x18] sm:$0xff]  ;;  %s253_s14 = sshll.u32 %s493_s13, 4  ;;  %s244_s23 = sshll.u32 %s556_s5, 4  ;;  %s254_s14 = int_to_ptr.vmem [resolvable:$true] %s253_s14  ;;  %s245_s23 = int_to_ptr.hbm [resolvable:$true] %s244_s23 }
  0x11   :  { %v350_v5 = vld [vmem:[#allocation7 + $0x38] sm:$0xff]  ;;  %v337_v6 = vld [vmem:[#allocation5 + $0x10] sm:$0xff]  ;;  %v336_v8 = vld [vmem:[#allocation5 + $0x8] sm:$0xff] }
  0x12   :  { %222 = vmatpush.bf16.xpose.msra.mxu1 %v350_v5  ;;  %v349_v7 = vld [vmem:[#allocation7 + $0x30] sm:$0xff]  ;;  %v348_v9 = vld [vmem:[#allocation7 + $0x28] sm:$0xff]  ;;  %v335_v10 = vld [vmem:[#allocation5] sm:$0xff] }
  0x13   :  { %v347_v11 = vld [vmem:[#allocation7 + $0x20] sm:$0xff]  ;;  %v69_v12 = vld [vmem:[#allocation2] sm:$0xf]  ;;  %v345_v14 = vld [vmem:[#allocation7 + $0x10] sm:$0xff] }
  0x14   :  { %v346_v13 = vld [vmem:[#allocation7 + $0x18] sm:$0xff]  ;;  %v344_v15 = vld [vmem:[#allocation7 + $0x8] sm:$0xff]  ;;  %v343_v16 = vld [vmem:[#allocation7] sm:$0xff] }
  0x15   :  { %v358_v17 = vld [vmem:[%s553_s2] ss:$0 sm:$0xff]  ;;  %s494_s2 = smov [#allocation8]  }
  0x16   :  { %v359_v23 = vld [vmem:[%s555_s4] ss:$0 sm:$0xff]  ;;  %s242_s20 = sshll.u32 %s494_s2, 4  ;;  %s243_s20 = int_to_ptr.vmem [resolvable:$true] %s242_s20 }
  0x18   :  { %139 = vmatpush.bf16.xpose.msra.mxu0 %v341_v1 }
  0x1a   :  { %223 = vmatpush.bf16.xpose.msra.mxu1 %v349_v7 }
  0x20   :  { %140 = vmatpush.bf16.xpose.msra.mxu0 %v340_v2 }
  0x22   :  { %224 = vmatpush.bf16.xpose.msra.mxu1 %v348_v9 }
  0x28   :  { %141 = vmatpush.bf16.xpose.msra.mxu0 %v339_v3 }
  0x2a   :  { %225 = vmatpush.bf16.xpose.msra.mxu1 %v347_v11 }
  0x30   :  { %142 = vmatpush.bf16.xpose.msra.mxu0 %v338_v4 }
  0x32   :  { %226 = vmatpush.bf16.xpose.msra.mxu1 %v346_v13 }
  0x38   :  { %143 = vmatpush.bf16.xpose.msra.mxu0 %v337_v6 }
  0x3a   :  { %227 = vmatpush.bf16.xpose.msra.mxu1 %v345_v14 }
  0x40   :  { %144 = vmatpush.bf16.xpose.msra.mxu0 %v336_v8 }
  0x42   :  { %228 = vmatpush.bf16.xpose.msra.mxu1 %v344_v15 }
  0x48   :  { %145 = vmatpush.bf16.xpose.msra.mxu0 %v335_v10 }
  0x4a   :  { %229 = vmatpush.bf16.xpose.msra.mxu1 %v343_v16 }
  0x4f   :  { %146 = vmatmul.bf16.vlgmr.msra.gmra.mxu0 %v69_v12 }
  0xcc   :  { %v147_v18 = vpop.f32.mrf.mxu0 }
  0xcd   :  { %v148_v19 = vadd.f32 %v358_v17, %v147_v18 }
  0xcf   :  { %v151_v20 = vmax.f32 %v148_v19, 0.0 }
  0xd1   :  { %152 = vst [vmem:[#allocation9] sm:$0xff] %v151_v20  ;;  %v153_v21 = vpack.c.bf16 %v151_v20, %v151_v20 }
  0xd2   :  { %258 = dma.vmem_to_hbm [thread:$0]  %s254_s14, 128, %s256_s17, [#allocation10]  }
  0xd3   :  { %230 = vmatmul.bf16.vlgmr.msra.gmra.mxu1 %v153_v21 }
  0xd4   :  { %v149_v22 = vpop.f32.mrf.mxu0 }
 0x150   :  { %v231_v24 = vpop.f32.mrf.mxu1 }
 0x151   :  { %v232_v25 = vadd.f32 %v359_v23, %v231_v24 }
 0x153   :  { %v235_v26 = vmax.f32 %v232_v25, 0.0 }
 0x155   :  { %236 = vst [vmem:[#allocation8] sm:$0xff] %v235_v26 }
 0x156   :  { %247 = dma.vmem_to_hbm [thread:$0]  %s243_s20, 128, %s245_s23, [#allocation4]  }
 0x158   :  { %v233_v27 = vpop.f32.mrf.mxu1 }
 0x159   :  { %484 = dma.done.wait [#allocation4], 128  }
 0x15a   :  { %485 = vsyncadd [#allocation4], 4294967168 }
 0x15b   :  { %486 = dma.done.wait [#allocation10], 128  }
 0x15c   :  { %487 = vsyncadd [#allocation10], 4294967168 }
 0x15d   :  { %267 = vsyncpa [#allocation3], 1 }
 0x15e   :  { %268 = vsyncpa [#allocation6], 1 }
 0x15f   :  { %269 = vsyncpa [#allocation4], 1 }
 0x160   :  { %270 = vsyncpa [#allocation10], 1 }

</bundles_post_ra>
